<compile_context>
chip_gen: v7x
topology: tpu7x:2x2x1
jax: 0.10.0
libtpu: 0.0.40
codegen_flags: <defaults>
</compile_context>

<pallas_src>
import functools

import jax
import jax.numpy as jnp
from jax.experimental import pallas as pl
from jax.experimental.pallas import tpu as pltpu

IN_FEATURES = 28 * 28 * 3   # 2352
OUT_FEATURES = 1
TILE_B_DEFAULT = 512        # safe for v5e's 16 MiB default scoped VMEM; use 1024 on v6e/v7x


def _round_up(x: int, m: int) -> int:
    return ((x + m - 1) // m) * m


def mock_classifier_kernel(x_ref, w_ref, b_ref, o_ref):
    # x_ref: (TILE_B, K_pad) f32 in VMEM   (one batch tile)
    # w_ref: (K_pad, 1)      f32 in VMEM   (resident across the grid)
    # b_ref: (1, 1)          f32 in SMEM   (scalar bias)
    # o_ref: (TILE_B, 1)     f32 in VMEM
    logits = jnp.dot(x_ref[...], w_ref[...],
                     preferred_element_type=jnp.float32)      # MXU matmul
    o_ref[...] = jax.nn.sigmoid(logits + b_ref[0, 0])          # VPU/EUP sigmoid


@functools.partial(jax.jit, static_argnames=("tile_b",))
def mock_classifier_forward(x_nchw, w, b, *, tile_b=TILE_B_DEFAULT):
    """x_nchw: (B, 3, 28, 28) f32; w: (2352, 1) f32; b: (1, 1) f32 -> (B, 1)."""
    B = x_nchw.shape[0]
    x_flat = x_nchw.reshape(B, -1).astype(jnp.float32)  # matches torch .view(B, -1)

    # Lane-dense feature axis: pad K from 2352 to 2432 (= 19 * 128) with zeros.
    k_pad = _round_up(IN_FEATURES, 128)
    x_flat = jnp.pad(x_flat, ((0, 0), (0, k_pad - IN_FEATURES)))
    w_p = jnp.pad(w.astype(jnp.float32), ((0, k_pad - IN_FEATURES), (0, 0)))
    b_p = b.astype(jnp.float32).reshape(1, 1)

    # Batch tile: no bigger than needed, sublane-aligned (multiple of 8).
    tile_b_eff = min(tile_b, _round_up(B, 8))
    b_padded = _round_up(B, tile_b_eff)
    if b_padded != B:
        x_flat = jnp.pad(x_flat, ((0, b_padded - B), (0, 0)))

    grid = (b_padded // tile_b_eff,)

    cost = pl.CostEstimate(
        flops=2 * b_padded * k_pad * OUT_FEATURES,
        transcendentals=b_padded,
        bytes_accessed=b_padded * k_pad * 4 + k_pad * 4 + b_padded * 4,
    )

    out = pl.pallas_call(
        mock_classifier_kernel,
        out_shape=jax.ShapeDtypeStruct((b_padded, OUT_FEATURES), jnp.float32),
        grid=grid,
        in_specs=[
            # Activations: one (TILE_B, K) tile per grid step -> double-buffered DMA.
            pl.BlockSpec((tile_b_eff, k_pad), lambda i: (i, 0)),
            # Weights: constant block index -> fetched once, resident in VMEM.
            pl.BlockSpec((k_pad, OUT_FEATURES), lambda i: (0, 0)),
            # Bias: scalar in SMEM.
            pl.BlockSpec(memory_space=pltpu.SMEM),
        ],
        out_specs=pl.BlockSpec((tile_b_eff, OUT_FEATURES), lambda i: (i, 0)),
        compiler_params=pltpu.CompilerParams(
            dimension_semantics=("parallel",),
        ),
        cost_estimate=cost,
    )(x_flat, w_p, b_p)

    # Drop the zero-padded rows (their logits are meaningless).
    return out[:B]


if __name__ == "__main__":
    key = jax.random.PRNGKey(0)
    kx, kw, kb = jax.random.split(key, 3)

    # Small-but-faithful shapes implied by the module: batch=2, NCHW 3x28x28.
    B = 2
    x = jax.random.normal(kx, (B, 3, 28, 28), dtype=jnp.float32)

    # Deterministic parameter init mimicking nn.Linear's uniform(-1/sqrt(in), 1/sqrt(in)).
    bound = 1.0 / (IN_FEATURES ** 0.5)
    w = jax.random.uniform(kw, (IN_FEATURES, OUT_FEATURES),
                           minval=-bound, maxval=bound, dtype=jnp.float32)
    b = jax.random.uniform(kb, (1, 1),
                           minval=-bound, maxval=bound, dtype=jnp.float32)

    out = mock_classifier_forward(x, w, b)
    out = jax.block_until_ready(out)

    # Pure-JAX reference check.
    ref = jax.nn.sigmoid(x.reshape(B, -1) @ w + b[0, 0])
    assert out.shape == (B, 1)
    assert jnp.allclose(out, ref, atol=1e-5, rtol=1e-5)

    print("KERNEL_OK")
</pallas_src>

<mosaic_0001>
module attributes {stable_mosaic.version = 11 : i64} {
  func.func @mock_classifier_kernel(%arg0: i32, %arg1: memref<8x2432xf32, #tpu.memory_space<vmem>>, %arg2: memref<2432x1xf32, #tpu.memory_space<vmem>>, %arg3: memref<1x1xf32, #tpu.memory_space<smem>>, %arg4: memref<8x1xf32, #tpu.memory_space<vmem>>) attributes {dimension_semantics = [#tpu.dimension_semantics<parallel>], iteration_bounds = array<i64: 1>, scalar_prefetch = 0 : i64, scratch_operands = 0 : i64, tpu.core_type = #tpu.core_type<tc>, window_params = [{transform_indices = @transform_0, window_bounds = array<i64: 8, 2432>}, {pipeline_mode = #tpu.pipeline_mode<synchronous>, transform_indices = @transform_1, window_bounds = array<i64: 2432, 1>}, {transform_indices = @transform_2, window_bounds = array<i64: 1, 1>}, {transform_indices = @transform_3, window_bounds = array<i64: 8, 1>}]} {
    %c0 = arith.constant 0 : index
    %c0_0 = arith.constant 0 : index
    %0 = vector.load %arg1[%c0, %c0_0] : memref<8x2432xf32, #tpu.memory_space<vmem>>, vector<8x2432xf32>
    %c0_1 = arith.constant 0 : index
    %c0_2 = arith.constant 0 : index
    %1 = vector.load %arg2[%c0_1, %c0_2] : memref<2432x1xf32, #tpu.memory_space<vmem>>, vector<2432x1xf32>
    %cst = arith.constant dense<0.000000e+00> : vector<8x1xf32>
    %2 = tpu.matmul %0, %1, %cst {dimension_numbers = #tpu.dot_dimension_numbers<[1], [0], [0], [1], [0, 0, 1, 1], [], []>} : vector<8x2432xf32>, vector<2432x1xf32>, vector<8x1xf32> -> vector<8x1xf32>
    %c0_3 = arith.constant 0 : index
    %c0_4 = arith.constant 0 : index
    %3 = memref.load %arg3[%c0_3, %c0_4] : memref<1x1xf32, #tpu.memory_space<smem>>
    %4 = vector.broadcast %3 : f32 to vector<8x1xf32>
    %5 = arith.addf %2, %4 : vector<8x1xf32>
    %6 = arith.negf %5 : vector<8x1xf32>
    %7 = math.exp %6 : vector<8x1xf32>
    %cst_5 = arith.constant 1.000000e+00 : f32
    %8 = vector.broadcast %cst_5 : f32 to vector<8x1xf32>
    %9 = arith.addf %8, %7 : vector<8x1xf32>
    %10 = arith.divf %8, %9 : vector<8x1xf32>
    %c0_6 = arith.constant 0 : index
    %c0_7 = arith.constant 0 : index
    %11 = vector.load %arg4[%c0_6, %c0_7] : memref<8x1xf32, #tpu.memory_space<vmem>>, vector<8x1xf32>
    tpu.vector_store %arg4[%c0_6, %c0_7], %10 {strides = array<i32>} : memref<8x1xf32, #tpu.memory_space<vmem>>, vector<8x1xf32>,
    return
  }
  func.func @transform_0(%arg0: i32) -> (i32, i32) {
    %c0_i32 = arith.constant 0 : i32
    %c0_i32_0 = arith.constant 0 : i32
    return %arg0, %c0_i32 : i32, i32
  }
  func.func @transform_1(%arg0: i32) -> (i32, i32) {
    %c0_i32 = arith.constant 0 : i32
    %c0_i32_0 = arith.constant 0 : i32
    %c0_i32_1 = arith.constant 0 : i32
    return %c0_i32, %c0_i32_0 : i32, i32
  }
  func.func @transform_2(%arg0: i32) -> (i32, i32) {
    %c0_i32 = arith.constant 0 : i32
    %c0_i32_0 = arith.constant 0 : i32
    %c0_i32_1 = arith.constant 0 : i32
    return %c0_i32, %c0_i32_0 : i32, i32
  }
  func.func @transform_3(%arg0: i32) -> (i32, i32) {
    %c0_i32 = arith.constant 0 : i32
    %c0_i32_0 = arith.constant 0 : i32
    return %arg0, %c0_i32 : i32, i32
  }
}

</mosaic_0001>

<bundles_post_ra>
// kernel: mock_classifier_forward.1
= control target key start
LH: loop header
LB: loop body
LE: loop exit
PB: predicated region body
PF: predicated region fallthrough
CT: control target
= control target key end

     0   :  { %vm1740_vm0 = vmmov 0   ;;  %vm1046_vm1 = vcmask 7168   ;;  %s2745_s1 = inlined_call_operand.vmem [shape: f32[2432,1], index: 1, kind: input, shape index: {}]   ;;  %s2746_s0 = inlined_call_operand.vmem [shape: f32[8,2432], index: 0, kind: input, shape index: {}]   ;;  %s2747_s2 = inlined_call_operand.<no memory space> [shape: f32[1,1], index: 2, kind: input, shape index: {}]   ;;  %s2748_s3 = inlined_call_operand.vmem [shape: f32[8,1], index: 3, kind: output, shape index: {}]  }
   0x1   :  { %v50_v0 = vld [vmem:[%s2745_s1 + $0x80] sm:$0xff]  ;;  %v51_v1 = vld [vmem:[%s2745_s1 + $0x88] sm:$0xff]  ;;  %v52_v11 = vld [vmem:[%s2745_s1 + $0x90] sm:$0xff] }
   0x2   :  { %v34_v2 = vld [vmem:[%s2745_s1] sm:$0xff]  ;;  %v1420_v3 = vpack.c.bf16 %v51_v1, %v50_v0  ;;  %v35_v4 = vld [vmem:[%s2745_s1 + $0x8] sm:$0xff]  ;;  %v53_v13 = vld [vmem:[%s2745_s1 + $0x98] sm:$0xff] }
   0x3   :  { %v82_v5 = vld [vmem:[%s2745_s1 + $0x180] sm:$0xff]  ;;  %v83_v6 = vld [vmem:[%s2745_s1 + $0x188] sm:$0xff]  ;;  %v1422_v7 = vpack.c.bf16 %v35_v4, %v34_v2  ;;  %v36_v14 = vld [vmem:[%s2745_s1 + $0x10] sm:$0xff]  ;;  %v1424_v16 = vpack.c.bf16 %v53_v13, %v52_v11 }
   0x4   :  { %v1452_v8 = vpack.c.bf16 %v83_v6, %v82_v5  ;;  %v66_v9 = vld [vmem:[%s2745_s1 + $0x100] sm:$0xff]  ;;  %v67_v10 = vld [vmem:[%s2745_s1 + $0x108] sm:$0xff]  ;;  %1421 = vmatprep.subr.bf16.mxu0 %v1420_v3  ;;  %v37_v15 = vld [vmem:[%s2745_s1 + $0x18] sm:$0xff] }
   0x5   :  { %v1454_v12 = vpack.c.bf16 %v67_v10, %v66_v9  ;;  %1423 = vmatpush3.bf16.msra.mxu0 %v1422_v7  ;;  %v1426_v17 = vpack.c.bf16 %v37_v15, %v36_v14  ;;  %v84_v18 = vld [vmem:[%s2745_s1 + $0x190] sm:$0xff]  ;;  %v85_v19 = vld [vmem:[%s2745_s1 + $0x198] sm:$0xff]  ;;  %v54_v23 = vld [vmem:[%s2745_s1 + $0xa0] sm:$0xff] }
   0x6   :  { %1453 = vmatprep.subr.bf16.mxu1 %v1452_v8  ;;  %v68_v20 = vld [vmem:[%s2745_s1 + $0x110] sm:$0xff]  ;;  %v1456_v21 = vpack.c.bf16 %v85_v19, %v84_v18  ;;  %v69_v22 = vld [vmem:[%s2745_s1 + $0x118] sm:$0xff]  ;;  %v55_v24 = vld [vmem:[%s2745_s1 + $0xa8] sm:$0xff]  ;;  %1425 = vmatprep.subr.bf16.mxu0 %v1424_v16 }
   0x7   :  { %1455 = vmatpush3.bf16.msra.mxu1 %v1454_v12  ;;  %v1458_v25 = vpack.c.bf16 %v69_v22, %v68_v20  ;;  %v1428_v26 = vpack.c.bf16 %v55_v24, %v54_v23  ;;  %v38_v27 = vld [vmem:[%s2745_s1 + $0x20] sm:$0xff]  ;;  %v39_v28 = vld [vmem:[%s2745_s1 + $0x28] sm:$0xff]  ;;  %v56_v35 = vld [vmem:[%s2745_s1 + $0xb0] sm:$0xff] }
   0x8   :  { %v86_v29 = vld [vmem:[%s2745_s1 + $0x1a0] sm:$0xff]  ;;  %1457 = vmatprep.subr.bf16.mxu1 %v1456_v21  ;;  %v87_v30 = vld [vmem:[%s2745_s1 + $0x1a8] sm:$0xff]  ;;  %v1430_v33 = vpack.c.bf16 %v39_v28, %v38_v27  ;;  %v57_v36 = vld [vmem:[%s2745_s1 + $0xb8] sm:$0xff] }
   0x9   :  { %v70_v31 = vld [vmem:[%s2745_s1 + $0x120] sm:$0xff]  ;;  %v71_v32 = vld [vmem:[%s2745_s1 + $0x128] sm:$0xff]  ;;  %1427 = vmatpush3.bf16.msra.mxu0 %v1426_v17  ;;  %v1460_v34 = vpack.c.bf16 %v87_v30, %v86_v29  ;;  %v40_v37 = vld [vmem:[%s2745_s1 + $0x30] sm:$0xff]  ;;  %v1432_v39 = vpack.c.bf16 %v57_v36, %v56_v35 }
   0xa   :  { %1429 = vmatprep.subr.bf16.mxu0 %v1428_v26  ;;  %v1462_v38 = vpack.c.bf16 %v71_v32, %v70_v31  ;;  %v41_v40 = vld [vmem:[%s2745_s1 + $0x38] sm:$0xff]  ;;  %v88_v41 = vld [vmem:[%s2745_s1 + $0x1b0] sm:$0xff]  ;;  %v58_v46 = vld [vmem:[%s2745_s1 + $0xc0] sm:$0xff] }
   0xb   :  { %1459 = vmatpush3.bf16.msra.mxu1 %v1458_v25  ;;  %v89_v42 = vld [vmem:[%s2745_s1 + $0x1b8] sm:$0xff]  ;;  %v72_v44 = vld [vmem:[%s2745_s1 + $0x130] sm:$0xff]  ;;  %v59_v47 = vld [vmem:[%s2745_s1 + $0xc8] sm:$0xff]  ;;  %v1434_v48 = vpack.c.bf16 %v41_v40, %v40_v37 }
   0xc   :  { %1461 = vmatprep.subr.bf16.mxu1 %v1460_v34  ;;  %v1464_v43 = vpack.c.bf16 %v89_v42, %v88_v41  ;;  %v73_v45 = vld [vmem:[%s2745_s1 + $0x138] sm:$0xff]  ;;  %v90_v49 = vld [vmem:[%s2745_s1 + $0x1c0] sm:$0xff]  ;;  %v91_v50 = vld [vmem:[%s2745_s1 + $0x1c8] sm:$0xff]  ;;  %v1436_v52 = vpack.c.bf16 %v59_v47, %v58_v46 }
   0xd   :  { %1431 = vmatpush3.bf16.msra.mxu0 %v1430_v33  ;;  %v1466_v51 = vpack.c.bf16 %v73_v45, %v72_v44  ;;  %v42_v53 = vld [vmem:[%s2745_s1 + $0x40] sm:$0xff]  ;;  %v43_v54 = vld [vmem:[%s2745_s1 + $0x48] sm:$0xff]  ;;  %v1468_v56 = vpack.c.bf16 %v91_v50, %v90_v49  ;;  %v60_v58 = vld [vmem:[%s2745_s1 + $0xd0] sm:$0xff] }
   0xe   :  { %1433 = vmatprep.subr.bf16.mxu0 %v1432_v39  ;;  %v74_v55 = vld [vmem:[%s2745_s1 + $0x140] sm:$0xff]  ;;  %v75_v57 = vld [vmem:[%s2745_s1 + $0x148] sm:$0xff]  ;;  %v61_v59 = vld [vmem:[%s2745_s1 + $0xd8] sm:$0xff]  ;;  %v1438_v62 = vpack.c.bf16 %v43_v54, %v42_v53 }
   0xf   :  { %1463 = vmatpush3.bf16.msra.mxu1 %v1462_v38  ;;  %v92_v60 = vld [vmem:[%s2745_s1 + $0x1d0] sm:$0xff]  ;;  %v93_v61 = vld [vmem:[%s2745_s1 + $0x1d8] sm:$0xff]  ;;  %v1470_v63 = vpack.c.bf16 %v75_v57, %v74_v55  ;;  %v1440_v0 = vpack.c.bf16 %v61_v59, %v60_v58  ;;  %v62_v6 = vld [vmem:[%s2745_s1 + $0xe0] sm:$0xff] }
  0x10   :  { %1465 = vmatprep.subr.bf16.mxu1 %v1464_v43  ;;  %v44_v1 = vld [vmem:[%s2745_s1 + $0x50] sm:$0xff]  ;;  %v45_v2 = vld [vmem:[%s2745_s1 + $0x58] sm:$0xff]  ;;  %v1472_v4 = vpack.c.bf16 %v93_v61, %v92_v60  ;;  %v63_v7 = vld [vmem:[%s2745_s1 + $0xe8] sm:$0xff] }
  0x11   :  { %1435 = vmatpush3.bf16.msra.mxu0 %v1434_v48  ;;  %v76_v3 = vld [vmem:[%s2745_s1 + $0x150] sm:$0xff]  ;;  %v77_v5 = vld [vmem:[%s2745_s1 + $0x158] sm:$0xff]  ;;  %v94_v8 = vld [vmem:[%s2745_s1 + $0x1e0] sm:$0xff]  ;;  %v1442_v10 = vpack.c.bf16 %v45_v2, %v44_v1  ;;  %v1444_v14 = vpack.c.bf16 %v63_v7, %v62_v6 }
  0x12   :  { %1437 = vmatprep.subr.bf16.mxu0 %v1436_v52  ;;  %v95_v9 = vld [vmem:[%s2745_s1 + $0x1e8] sm:$0xff]  ;;  %v46_v11 = vld [vmem:[%s2745_s1 + $0x60] sm:$0xff]  ;;  %v1474_v13 = vpack.c.bf16 %v77_v5, %v76_v3  ;;  %v64_v19 = vld [vmem:[%s2745_s1 + $0xf0] sm:$0xff] }
  0x13   :  { %1467 = vmatpush3.bf16.msra.mxu1 %v1466_v51  ;;  %v16_v12 = vld [vmem:[%s2746_s0 + $0x8] sm:$0xff]  ;;  %v78_v16 = vld [vmem:[%s2745_s1 + $0x160] sm:$0xff]  ;;  %v1476_v18 = vpack.c.bf16 %v95_v9, %v94_v8  ;;  %v65_v20 = vld [vmem:[%s2745_s1 + $0xf8] sm:$0xff] }
  0x14   :  { %1469 = vmatprep.subr.bf16.mxu1 %v1468_v56  ;;  %v47_v15 = vld [vmem:[%s2745_s1 + $0x68] sm:$0xff]  ;;  %404 = vmatprep.mubr.f32.mxu0 %v16_v12  ;;  %v18_v21 = vld [vmem:[%s2746_s0 + $0x18] sm:$0xff]  ;;  %v96_v22 = vld [vmem:[%s2745_s1 + $0x1f0] sm:$0xff]  ;;  %v1448_v26 = vpack.c.bf16 %v65_v20, %v64_v19 }
  0x15   :  { %1439 = vmatpush3.bf16.msra.mxu0 %v1438_v62  ;;  %v79_v17 = vld [vmem:[%s2745_s1 + $0x168] sm:$0xff]  ;;  %v97_v23 = vld [vmem:[%s2745_s1 + $0x1f8] sm:$0xff]  ;;  %474 = vmatprep.mubr.f32.mxu1 %v18_v21  ;;  %v1446_v24 = vpack.c.bf16 %v47_v15, %v46_v11  ;;  %v48_v27 = vld [vmem:[%s2745_s1 + $0x70] sm:$0xff] }
  0x16   :  { %1441 = vmatprep.subr.bf16.mxu0 %v1440_v0  ;;  %v1478_v25 = vpack.c.bf16 %v79_v17, %v78_v16  ;;  %v49_v28 = vld [vmem:[%s2745_s1 + $0x78] sm:$0xff]  ;;  %v80_v29 = vld [vmem:[%s2745_s1 + $0x170] sm:$0xff]  ;;  %v1480_v30 = vpack.c.bf16 %v97_v23, %v96_v22  ;;  %v114_v32 = vld [vmem:[%s2745_s1 + $0x280] sm:$0xff] }
  0x17   :  { %1471 = vmatpush3.bf16.msra.mxu1 %v1470_v63  ;;  %v81_v31 = vld [vmem:[%s2745_s1 + $0x178] sm:$0xff]  ;;  %v115_v33 = vld [vmem:[%s2745_s1 + $0x288] sm:$0xff]  ;;  %v146_v34 = vld [vmem:[%s2745_s1 + $0x380] sm:$0xff]  ;;  %v1450_v36 = vpack.c.bf16 %v49_v28, %v48_v27 }
  0x18   :  { %1473 = vmatprep.subr.bf16.mxu1 %v1472_v4  ;;  %v147_v35 = vld [vmem:[%s2745_s1 + $0x388] sm:$0xff]  ;;  %v1482_v37 = vpack.c.bf16 %v81_v31, %v80_v29  ;;  %v1484_v38 = vpack.c.bf16 %v115_v33, %v114_v32  ;;  %v98_v39 = vld [vmem:[%s2745_s1 + $0x200] sm:$0xff]  ;;  %v116_v44 = vld [vmem:[%s2745_s1 + $0x290] sm:$0xff] }
  0x19   :  { %1443 = vmatpush3.bf16.msra.mxu0 %v1442_v10  ;;  %v99_v40 = vld [vmem:[%s2745_s1 + $0x208] sm:$0xff]  ;;  %v130_v41 = vld [vmem:[%s2745_s1 + $0x300] sm:$0xff]  ;;  %v1516_v42 = vpack.c.bf16 %v147_v35, %v146_v34  ;;  %v117_v45 = vld [vmem:[%s2745_s1 + $0x298] sm:$0xff] }
  0x1a   :  { %1445 = vmatprep.subr.bf16.mxu0 %v1444_v14  ;;  %v131_v43 = vld [vmem:[%s2745_s1 + $0x308] sm:$0xff]  ;;  %v148_v46 = vld [vmem:[%s2745_s1 + $0x390] sm:$0xff]  ;;  %v149_v47 = vld [vmem:[%s2745_s1 + $0x398] sm:$0xff]  ;;  %v1486_v49 = vpack.c.bf16 %v99_v40, %v98_v39  ;;  %v1488_v52 = vpack.c.bf16 %v117_v45, %v116_v44 }
  0x1b   :  { %1475 = vmatpush3.bf16.msra.mxu1 %v1474_v13  ;;  %v15_v48 = vld [vmem:[%s2746_s0] sm:$0xff]  ;;  %v17_v50 = vld [vmem:[%s2746_s0 + $0x10] sm:$0xff]  ;;  %v1518_v51 = vpack.c.bf16 %v131_v43, %v130_v41  ;;  %v101_v54 = vld [vmem:[%s2745_s1 + $0x218] sm:$0xff]  ;;  %v1520_v56 = vpack.c.bf16 %v149_v47, %v148_v46 }
  0x1c   :  { %1477 = vmatprep.subr.bf16.mxu1 %v1476_v18  ;;  %v100_v53 = vld [vmem:[%s2745_s1 + $0x210] sm:$0xff]  ;;  %v133_v57 = vld [vmem:[%s2745_s1 + $0x318] sm:$0xff]  ;;  %v118_v58 = vld [vmem:[%s2745_s1 + $0x2a0] sm:$0xff] }
  0x1d   :  { %1447 = vmatpush3.bf16.msra.mxu0 %v1446_v24  ;;  %v132_v55 = vld [vmem:[%s2745_s1 + $0x310] sm:$0xff]  ;;  %v119_v59 = vld [vmem:[%s2745_s1 + $0x2a8] sm:$0xff]  ;;  %v150_v60 = vld [vmem:[%s2745_s1 + $0x3a0] sm:$0xff]  ;;  %v1490_v62 = vpack.c.bf16 %v101_v54, %v100_v53 }
  0x1e   :  { %1449 = vmatprep.subr.bf16.mxu0 %v1448_v26  ;;  %v151_v61 = vld [vmem:[%s2745_s1 + $0x3a8] sm:$0xff]  ;;  %v1522_v63 = vpack.c.bf16 %v133_v57, %v132_v55  ;;  %v1492_v0 = vpack.c.bf16 %v119_v59, %v118_v58  ;;  %v102_v1 = vld [vmem:[%s2745_s1 + $0x220] sm:$0xff]  ;;  %v120_v6 = vld [vmem:[%s2745_s1 + $0x2b0] sm:$0xff] }
  0x1f   :  { %1479 = vmatpush3.bf16.msra.mxu1 %v1478_v25  ;;  %v103_v2 = vld [vmem:[%s2745_s1 + $0x228] sm:$0xff]  ;;  %v134_v3 = vld [vmem:[%s2745_s1 + $0x320] sm:$0xff]  ;;  %v1524_v4 = vpack.c.bf16 %v151_v61, %v150_v60  ;;  %v121_v7 = vld [vmem:[%s2745_s1 + $0x2b8] sm:$0xff] }
  0x20   :  { %1481 = vmatprep.subr.bf16.mxu1 %v1480_v30  ;;  %v135_v5 = vld [vmem:[%s2745_s1 + $0x328] sm:$0xff]  ;;  %v152_v8 = vld [vmem:[%s2745_s1 + $0x3b0] sm:$0xff]  ;;  %v153_v9 = vld [vmem:[%s2745_s1 + $0x3b8] sm:$0xff]  ;;  %v1494_v10 = vpack.c.bf16 %v103_v2, %v102_v1  ;;  %v1496_v12 = vpack.c.bf16 %v121_v7, %v120_v6 }
  0x21   :  { %1451 = vmatpush3.bf16.msra.mxu0 %v1450_v36  ;;  %v1526_v11 = vpack.c.bf16 %v135_v5, %v134_v3  ;;  %v104_v13 = vld [vmem:[%s2745_s1 + $0x230] sm:$0xff]  ;;  %v105_v14 = vld [vmem:[%s2745_s1 + $0x238] sm:$0xff]  ;;  %v1528_v16 = vpack.c.bf16 %v153_v9, %v152_v8  ;;  %v122_v18 = vld [vmem:[%s2745_s1 + $0x2c0] sm:$0xff] }
  0x22   :  { %1485 = vmatprep.subr.bf16.mxu0 %v1484_v38  ;;  %v136_v15 = vld [vmem:[%s2745_s1 + $0x330] sm:$0xff]  ;;  %v137_v17 = vld [vmem:[%s2745_s1 + $0x338] sm:$0xff]  ;;  %v123_v19 = vld [vmem:[%s2745_s1 + $0x2c8] sm:$0xff]  ;;  %v1498_v23 = vpack.c.bf16 %v105_v14, %v104_v13 }
  0x23   :  { %1483 = vmatpush3.bf16.msra.mxu1 %v1482_v37  ;;  %v154_v20 = vld [vmem:[%s2745_s1 + $0x3c0] sm:$0xff]  ;;  %v155_v21 = vld [vmem:[%s2745_s1 + $0x3c8] sm:$0xff]  ;;  %v1530_v25 = vpack.c.bf16 %v137_v17, %v136_v15  ;;  %v1500_v26 = vpack.c.bf16 %v123_v19, %v122_v18  ;;  %v22_v29 = vld [vmem:[%s2746_s0 + $0x38] sm:$0xff] }
  0x24   :  { %1517 = vmatprep.subr.bf16.mxu1 %v1516_v42  ;;  %405 = vmatmul.mubr.f32.vlgmr.msra.gmra.mrb[0].mxu0 %v15_v48  ;;  %v20_v22 = vld [vmem:[%s2746_s0 + $0x28] sm:$0xff]  ;;  %v106_v24 = vld [vmem:[%s2745_s1 + $0x240] sm:$0xff]  ;;  %v1532_v30 = vpack.c.bf16 %v155_v21, %v154_v20  ;;  %v124_v32 = vld [vmem:[%s2745_s1 + $0x2d0] sm:$0xff] }
  0x25   :  { %1487 = vmatpush3.bf16.msra.mxu0 %v1486_v49  ;;  %544 = vmatprep.mubr.f32.mxu0 %v20_v22  ;;  %v107_v27 = vld [vmem:[%s2745_s1 + $0x248] sm:$0xff]  ;;  %v138_v28 = vld [vmem:[%s2745_s1 + $0x340] sm:$0xff]  ;;  %v125_v33 = vld [vmem:[%s2745_s1 + $0x2d8] sm:$0xff] }
  0x26   :  { %475 = vmatmul.mubr.f32.vlgmr.msra.gmra.mrb[0].mxu1 %v17_v50  ;;  %1489 = vmatprep.subr.bf16.mxu0 %v1488_v52  ;;  %v139_v31 = vld [vmem:[%s2745_s1 + $0x348] sm:$0xff]  ;;  %v156_v34 = vld [vmem:[%s2745_s1 + $0x3d0] sm:$0xff]  ;;  %v157_v35 = vld [vmem:[%s2745_s1 + $0x3d8] sm:$0xff]  ;;  %v1502_v36 = vpack.c.bf16 %v107_v27, %v106_v24  ;;  %v1504_v38 = vpack.c.bf16 %v125_v33, %v124_v32 }
  0x27   :  { %1519 = vmatpush3.bf16.msra.mxu1 %v1518_v51  ;;  %614 = vmatprep.mubr.f32.mxu1 %v22_v29  ;;  %v1534_v37 = vpack.c.bf16 %v139_v31, %v138_v28  ;;  %v108_v39 = vld [vmem:[%s2745_s1 + $0x250] sm:$0xff]  ;;  %v109_v40 = vld [vmem:[%s2745_s1 + $0x258] sm:$0xff]  ;;  %v1536_v42 = vpack.c.bf16 %v157_v35, %v156_v34  ;;  %v126_v44 = vld [vmem:[%s2745_s1 + $0x2e0] sm:$0xff] }
  0x28   :  { %1521 = vmatprep.subr.bf16.mxu1 %v1520_v56  ;;  %v140_v41 = vld [vmem:[%s2745_s1 + $0x350] sm:$0xff]  ;;  %v141_v43 = vld [vmem:[%s2745_s1 + $0x358] sm:$0xff]  ;;  %v127_v45 = vld [vmem:[%s2745_s1 + $0x2e8] sm:$0xff]  ;;  %v1506_v48 = vpack.c.bf16 %v109_v40, %v108_v39 }
  0x29   :  { %1491 = vmatpush3.bf16.msra.mxu0 %v1490_v62  ;;  %v158_v46 = vld [vmem:[%s2745_s1 + $0x3e0] sm:$0xff]  ;;  %v159_v47 = vld [vmem:[%s2745_s1 + $0x3e8] sm:$0xff]  ;;  %v1538_v49 = vpack.c.bf16 %v141_v43, %v140_v41  ;;  %v1508_v50 = vpack.c.bf16 %v127_v45, %v126_v44  ;;  %v128_v56 = vld [vmem:[%s2745_s1 + $0x2f0] sm:$0xff] }
  0x2a   :  { %1493 = vmatprep.subr.bf16.mxu0 %v1492_v0  ;;  %v110_v51 = vld [vmem:[%s2745_s1 + $0x260] sm:$0xff]  ;;  %v111_v52 = vld [vmem:[%s2745_s1 + $0x268] sm:$0xff]  ;;  %v1540_v54 = vpack.c.bf16 %v159_v47, %v158_v46  ;;  %v129_v57 = vld [vmem:[%s2745_s1 + $0x2f8] sm:$0xff] }
  0x2b   :  { %1523 = vmatpush3.bf16.msra.mxu1 %v1522_v63  ;;  %v142_v53 = vld [vmem:[%s2745_s1 + $0x360] sm:$0xff]  ;;  %v143_v55 = vld [vmem:[%s2745_s1 + $0x368] sm:$0xff]  ;;  %v160_v58 = vld [vmem:[%s2745_s1 + $0x3f0] sm:$0xff]  ;;  %v1510_v60 = vpack.c.bf16 %v111_v52, %v110_v51  ;;  %v1512_v62 = vpack.c.bf16 %v129_v57, %v128_v56 }
  0x2c   :  { %1525 = vmatprep.subr.bf16.mxu1 %v1524_v4  ;;  %v161_v59 = vld [vmem:[%s2745_s1 + $0x3f8] sm:$0xff]  ;;  %v1542_v61 = vpack.c.bf16 %v143_v55, %v142_v53  ;;  %v112_v63 = vld [vmem:[%s2745_s1 + $0x270] sm:$0xff]  ;;  %v178_v4 = vld [vmem:[%s2745_s1 + $0x480] sm:$0xff] }
  0x2d   :  { %1495 = vmatpush3.bf16.msra.mxu0 %v1494_v10  ;;  %v113_v0 = vld [vmem:[%s2745_s1 + $0x278] sm:$0xff]  ;;  %v144_v1 = vld [vmem:[%s2745_s1 + $0x370] sm:$0xff]  ;;  %v1544_v2 = vpack.c.bf16 %v161_v59, %v160_v58  ;;  %v179_v5 = vld [vmem:[%s2745_s1 + $0x488] sm:$0xff] }
  0x2e   :  { %1497 = vmatprep.subr.bf16.mxu0 %v1496_v12  ;;  %v145_v3 = vld [vmem:[%s2745_s1 + $0x378] sm:$0xff]  ;;  %v210_v6 = vld [vmem:[%s2745_s1 + $0x580] sm:$0xff]  ;;  %v211_v7 = vld [vmem:[%s2745_s1 + $0x588] sm:$0xff]  ;;  %v1514_v8 = vpack.c.bf16 %v113_v0, %v112_v63  ;;  %v1548_v10 = vpack.c.bf16 %v179_v5, %v178_v4 }
  0x2f   :  { %1527 = vmatpush3.bf16.msra.mxu1 %v1526_v11  ;;  %v1546_v9 = vpack.c.bf16 %v145_v3, %v144_v1  ;;  %v162_v11 = vld [vmem:[%s2745_s1 + $0x400] sm:$0xff]  ;;  %v163_v12 = vld [vmem:[%s2745_s1 + $0x408] sm:$0xff]  ;;  %v1580_v14 = vpack.c.bf16 %v211_v7, %v210_v6  ;;  %v181_v17 = vld [vmem:[%s2745_s1 + $0x498] sm:$0xff] }
  0x30   :  { %1529 = vmatprep.subr.bf16.mxu1 %v1528_v16  ;;  %v194_v13 = vld [vmem:[%s2745_s1 + $0x500] sm:$0xff]  ;;  %v195_v15 = vld [vmem:[%s2745_s1 + $0x508] sm:$0xff]  ;;  %v180_v16 = vld [vmem:[%s2745_s1 + $0x490] sm:$0xff]  ;;  %v1550_v21 = vpack.c.bf16 %v163_v12, %v162_v11 }
  0x31   :  { %1499 = vmatpush3.bf16.msra.mxu0 %v1498_v23  ;;  %v212_v18 = vld [vmem:[%s2745_s1 + $0x590] sm:$0xff]  ;;  %v213_v19 = vld [vmem:[%s2745_s1 + $0x598] sm:$0xff]  ;;  %v19_v20 = vld [vmem:[%s2746_s0 + $0x20] sm:$0xff]  ;;  %v1582_v23 = vpack.c.bf16 %v195_v15, %v194_v13  ;;  %v1552_v24 = vpack.c.bf16 %v181_v17, %v180_v16 }
  0x32   :  { %1501 = vmatprep.subr.bf16.mxu0 %v1500_v26  ;;  %v21_v22 = vld [vmem:[%s2746_s0 + $0x30] sm:$0xff]  ;;  %v165_v26 = vld [vmem:[%s2745_s1 + $0x418] sm:$0xff]  ;;  %v1584_v28 = vpack.c.bf16 %v213_v19, %v212_v18  ;;  %v183_v31 = vld [vmem:[%s2745_s1 + $0x4a8] sm:$0xff] }
  0x33   :  { %1531 = vmatpush3.bf16.msra.mxu1 %v1530_v25  ;;  %v164_v25 = vld [vmem:[%s2745_s1 + $0x410] sm:$0xff]  ;;  %v197_v29 = vld [vmem:[%s2745_s1 + $0x518] sm:$0xff]  ;;  %v214_v32 = vld [vmem:[%s2745_s1 + $0x5a0] sm:$0xff] }
  0x34   :  { %1533 = vmatprep.subr.bf16.mxu1 %v1532_v30  ;;  %v196_v27 = vld [vmem:[%s2745_s1 + $0x510] sm:$0xff]  ;;  %v182_v30 = vld [vmem:[%s2745_s1 + $0x4a0] sm:$0xff]  ;;  %v215_v33 = vld [vmem:[%s2745_s1 + $0x5a8] sm:$0xff]  ;;  %v1554_v35 = vpack.c.bf16 %v165_v26, %v164_v25 }
  0x35   :  { %1503 = vmatpush3.bf16.msra.mxu0 %v1502_v36  ;;  %v24_v34 = vld [vmem:[%s2746_s0 + $0x48] sm:$0xff]  ;;  %v26_v36 = vld [vmem:[%s2746_s0 + $0x58] sm:$0xff]  ;;  %v166_v39 = vld [vmem:[%s2745_s1 + $0x420] sm:$0xff] }
  0x36   :  { %1505 = vmatprep.subr.bf16.mxu0 %v1504_v38  ;;  %v1556_v38 = vpack.c.bf16 %v183_v31, %v182_v30  ;;  %v167_v40 = vld [vmem:[%s2745_s1 + $0x428] sm:$0xff]  ;;  %v198_v41 = vld [vmem:[%s2745_s1 + $0x520] sm:$0xff]  ;;  %v184_v44 = vld [vmem:[%s2745_s1 + $0x4b0] sm:$0xff] }
  0x37   :  { %1535 = vmatpush3.bf16.msra.mxu1 %v1534_v37  ;;  %v1586_v37 = vpack.c.bf16 %v197_v29, %v196_v27  ;;  %v199_v43 = vld [vmem:[%s2745_s1 + $0x528] sm:$0xff]  ;;  %v185_v45 = vld [vmem:[%s2745_s1 + $0x4b8] sm:$0xff]  ;;  %v216_v46 = vld [vmem:[%s2745_s1 + $0x5b0] sm:$0xff] }
  0x38   :  { %1537 = vmatprep.subr.bf16.mxu1 %v1536_v42  ;;  %v1588_v42 = vpack.c.bf16 %v215_v33, %v214_v32  ;;  %v217_v47 = vld [vmem:[%s2745_s1 + $0x5b8] sm:$0xff]  ;;  %v168_v51 = vld [vmem:[%s2745_s1 + $0x430] sm:$0xff]  ;;  %v186_v56 = vld [vmem:[%s2745_s1 + $0x4c0] sm:$0xff] }
  0x39   :  { %1507 = vmatpush3.bf16.msra.mxu0 %v1506_v48  ;;  %v1558_v48 = vpack.c.bf16 %v167_v40, %v166_v39  ;;  %v169_v52 = vld [vmem:[%s2745_s1 + $0x438] sm:$0xff]  ;;  %v200_v53 = vld [vmem:[%s2745_s1 + $0x530] sm:$0xff]  ;;  %v187_v57 = vld [vmem:[%s2745_s1 + $0x4c8] sm:$0xff] }
  0x3a   :  { %1509 = vmatprep.subr.bf16.mxu0 %v1508_v50  ;;  %v1560_v50 = vpack.c.bf16 %v185_v45, %v184_v44  ;;  %v201_v55 = vld [vmem:[%s2745_s1 + $0x538] sm:$0xff]  ;;  %v218_v58 = vld [vmem:[%s2745_s1 + $0x5c0] sm:$0xff]  ;;  %v219_v59 = vld [vmem:[%s2745_s1 + $0x5c8] sm:$0xff] }
  0x3b   :  { %1539 = vmatpush3.bf16.msra.mxu1 %v1538_v49  ;;  %v1590_v49 = vpack.c.bf16 %v199_v43, %v198_v41  ;;  %v170_v63 = vld [vmem:[%s2745_s1 + $0x440] sm:$0xff]  ;;  %v171_v0 = vld [vmem:[%s2745_s1 + $0x448] sm:$0xff]  ;;  %v188_v4 = vld [vmem:[%s2745_s1 + $0x4d0] sm:$0xff] }
  0x3c   :  { %1541 = vmatprep.subr.bf16.mxu1 %v1540_v54  ;;  %v1592_v54 = vpack.c.bf16 %v217_v47, %v216_v46  ;;  %v202_v1 = vld [vmem:[%s2745_s1 + $0x540] sm:$0xff]  ;;  %v203_v3 = vld [vmem:[%s2745_s1 + $0x548] sm:$0xff]  ;;  %v189_v5 = vld [vmem:[%s2745_s1 + $0x4d8] sm:$0xff] }
  0x3d   :  { %1511 = vmatpush3.bf16.msra.mxu0 %v1510_v60  ;;  %v1562_v60 = vpack.c.bf16 %v169_v52, %v168_v51  ;;  %v220_v6 = vld [vmem:[%s2745_s1 + $0x5d0] sm:$0xff]  ;;  %v221_v7 = vld [vmem:[%s2745_s1 + $0x5d8] sm:$0xff]  ;;  %v190_v16 = vld [vmem:[%s2745_s1 + $0x4e0] sm:$0xff] }
  0x3e   :  { %1513 = vmatprep.subr.bf16.mxu0 %v1512_v62  ;;  %v1564_v62 = vpack.c.bf16 %v187_v57, %v186_v56  ;;  %v172_v11 = vld [vmem:[%s2745_s1 + $0x450] sm:$0xff]  ;;  %v173_v12 = vld [vmem:[%s2745_s1 + $0x458] sm:$0xff]  ;;  %v191_v17 = vld [vmem:[%s2745_s1 + $0x4e8] sm:$0xff] }
  0x3f   :  { %1543 = vmatpush3.bf16.msra.mxu1 %v1542_v61  ;;  %v1594_v61 = vpack.c.bf16 %v201_v55, %v200_v53  ;;  %v204_v13 = vld [vmem:[%s2745_s1 + $0x550] sm:$0xff]  ;;  %v205_v15 = vld [vmem:[%s2745_s1 + $0x558] sm:$0xff]  ;;  %v222_v18 = vld [vmem:[%s2745_s1 + $0x5e0] sm:$0xff] }
  0x40   :  { %1545 = vmatprep.subr.bf16.mxu1 %v1544_v2  ;;  %v1596_v2 = vpack.c.bf16 %v219_v59, %v218_v58  ;;  %v223_v19 = vld [vmem:[%s2745_s1 + $0x5e8] sm:$0xff]  ;;  %v206_v25 = vld [vmem:[%s2745_s1 + $0x560] sm:$0xff]  ;;  %v193_v29 = vld [vmem:[%s2745_s1 + $0x4f8] sm:$0xff] }
  0x41   :  { %1515 = vmatpush3.bf16.msra.mxu0 %v1514_v8  ;;  %v1566_v8 = vpack.c.bf16 %v171_v0, %v170_v63  ;;  %v1604_v26 = vpack.c.bf16 %v223_v19, %v222_v18  ;;  %v207_v27 = vld [vmem:[%s2745_s1 + $0x568] sm:$0xff]  ;;  %v224_v30 = vld [vmem:[%s2745_s1 + $0x5f0] sm:$0xff]  ;;  %v225_v31 = vld [vmem:[%s2745_s1 + $0x5f8] sm:$0xff] }
  0x42   :  { %1549 = vmatprep.subr.bf16.mxu0 %v1548_v10  ;;  %v1568_v10 = vpack.c.bf16 %v189_v5, %v188_v4  ;;  %v1606_v33 = vpack.c.bf16 %v207_v27, %v206_v25  ;;  %v209_v39 = vld [vmem:[%s2745_s1 + $0x578] sm:$0xff]  ;;  %v242_v40 = vld [vmem:[%s2745_s1 + $0x680] sm:$0xff]  ;;  %v243_v41 = vld [vmem:[%s2745_s1 + $0x688] sm:$0xff] }
  0x43   :  { %1547 = vmatpush3.bf16.msra.mxu1 %v1546_v9  ;;  %v1598_v9 = vpack.c.bf16 %v203_v3, %v202_v1  ;;  %v275_v43 = vld [vmem:[%s2745_s1 + $0x788] sm:$0xff]  ;;  %v1612_v46 = vpack.c.bf16 %v243_v41, %v242_v40  ;;  %v226_v47 = vld [vmem:[%s2745_s1 + $0x600] sm:$0xff]  ;;  %v244_v52 = vld [vmem:[%s2745_s1 + $0x690] sm:$0xff] }
  0x44   :  { %1581 = vmatprep.subr.bf16.mxu1 %v1580_v14  ;;  %545 = vmatmul.mubr.f32.vlgmr.msra.gmra.mrb[2].mxu0 %v19_v20  ;;  %v1600_v14 = vpack.c.bf16 %v221_v7, %v220_v6  ;;  %v1570_v20 = vpack.c.bf16 %v173_v12, %v172_v11  ;;  %v259_v51 = vld [vmem:[%s2745_s1 + $0x708] sm:$0xff]  ;;  %v245_v53 = vld [vmem:[%s2745_s1 + $0x698] sm:$0xff]  ;;  %v23_v56 = vld [vmem:[%s2746_s0 + $0x40] sm:$0xff] }
  0x45   :  { %1551 = vmatpush3.bf16.msra.mxu0 %v1550_v21  ;;  %684 = vmatprep.mubr.f32.mxu0 %v24_v34  ;;  %v1602_v21 = vpack.c.bf16 %v205_v15, %v204_v13  ;;  %v277_v55 = vld [vmem:[%s2745_s1 + $0x798] sm:$0xff]  ;;  %v25_v58 = vld [vmem:[%s2746_s0 + $0x50] sm:$0xff]  ;;  %v247_v3 = vld [vmem:[%s2745_s1 + $0x6a8] sm:$0xff] }
  0x46   :  { %615 = vmatmul.mubr.f32.vlgmr.msra.gmra.mrb[2].mxu1 %v21_v22  ;;  %1553 = vmatprep.subr.bf16.mxu0 %v1552_v24  ;;  %v1572_v22 = vpack.c.bf16 %v191_v17, %v190_v16  ;;  %v175_v24 = vld [vmem:[%s2745_s1 + $0x468] sm:$0xff]  ;;  %v260_v63 = vld [vmem:[%s2745_s1 + $0x710] sm:$0xff]  ;;  %v261_v1 = vld [vmem:[%s2745_s1 + $0x718] sm:$0xff] }
  0x47   :  { %1583 = vmatpush3.bf16.msra.mxu1 %v1582_v23  ;;  %754 = vmatprep.mubr.f32.mxu1 %v26_v36  ;;  %v174_v23 = vld [vmem:[%s2745_s1 + $0x460] sm:$0xff]  ;;  %v177_v36 = vld [vmem:[%s2745_s1 + $0x478] sm:$0xff]  ;;  %v279_v5 = vld [vmem:[%s2745_s1 + $0x7a8] sm:$0xff] }
  0x48   :  { %1585 = vmatprep.subr.bf16.mxu1 %v1584_v28  ;;  %v192_v28 = vld [vmem:[%s2745_s1 + $0x4f0] sm:$0xff]  ;;  %v1574_v32 = vpack.c.bf16 %v175_v24, %v174_v23  ;;  %v278_v4 = vld [vmem:[%s2745_s1 + $0x7a0] sm:$0xff]  ;;  %v28_v6 = vld [vmem:[%s2746_s0 + $0x68] sm:$0xff] }
  0x49   :  { %1555 = vmatpush3.bf16.msra.mxu0 %v1554_v35  ;;  %v1576_v34 = vpack.c.bf16 %v193_v29, %v192_v28  ;;  %v176_v35 = vld [vmem:[%s2745_s1 + $0x470] sm:$0xff]  ;;  %v230_v11 = vld [vmem:[%s2745_s1 + $0x620] sm:$0xff]  ;;  %v231_v12 = vld [vmem:[%s2745_s1 + $0x628] sm:$0xff] }
  0x4a   :  { %1557 = vmatprep.subr.bf16.mxu0 %v1556_v38  ;;  %v1608_v38 = vpack.c.bf16 %v225_v31, %v224_v30  ;;  %v1578_v44 = vpack.c.bf16 %v177_v36, %v176_v35  ;;  %v262_v13 = vld [vmem:[%s2745_s1 + $0x720] sm:$0xff]  ;;  %v263_v15 = vld [vmem:[%s2745_s1 + $0x728] sm:$0xff]  ;;  %v248_v16 = vld [vmem:[%s2745_s1 + $0x6b0] sm:$0xff] }
  0x4b   :  { %1587 = vmatpush3.bf16.msra.mxu1 %v1586_v37  ;;  %v208_v37 = vld [vmem:[%s2745_s1 + $0x570] sm:$0xff]  ;;  %v249_v17 = vld [vmem:[%s2745_s1 + $0x6b8] sm:$0xff]  ;;  %v250_v28 = vld [vmem:[%s2745_s1 + $0x6c0] sm:$0xff] }
  0x4c   :  { %1589 = vmatprep.subr.bf16.mxu1 %v1588_v42  ;;  %v274_v42 = vld [vmem:[%s2745_s1 + $0x780] sm:$0xff]  ;;  %v1610_v45 = vpack.c.bf16 %v209_v39, %v208_v37  ;;  %v280_v18 = vld [vmem:[%s2745_s1 + $0x7b0] sm:$0xff]  ;;  %v281_v19 = vld [vmem:[%s2745_s1 + $0x7b8] sm:$0xff] }
  0x4d   :  { %1559 = vmatpush3.bf16.msra.mxu0 %v1558_v48  ;;  %v227_v48 = vld [vmem:[%s2745_s1 + $0x608] sm:$0xff]  ;;  %v232_v23 = vld [vmem:[%s2745_s1 + $0x630] sm:$0xff]  ;;  %v233_v24 = vld [vmem:[%s2745_s1 + $0x638] sm:$0xff] }
  0x4e   :  { %1561 = vmatprep.subr.bf16.mxu0 %v1560_v50  ;;  %v1644_v50 = vpack.c.bf16 %v275_v43, %v274_v42  ;;  %v1614_v57 = vpack.c.bf16 %v227_v48, %v226_v47  ;;  %v264_v25 = vld [vmem:[%s2745_s1 + $0x730] sm:$0xff]  ;;  %v265_v27 = vld [vmem:[%s2745_s1 + $0x738] sm:$0xff]  ;;  %v251_v29 = vld [vmem:[%s2745_s1 + $0x6c8] sm:$0xff] }
  0x4f   :  { %1591 = vmatpush3.bf16.msra.mxu1 %v1590_v49  ;;  %v258_v49 = vld [vmem:[%s2745_s1 + $0x700] sm:$0xff]  ;;  %v283_v31 = vld [vmem:[%s2745_s1 + $0x7c8] sm:$0xff]  ;;  %v252_v40 = vld [vmem:[%s2745_s1 + $0x6d0] sm:$0xff] }
  0x50   :  { %1593 = vmatprep.subr.bf16.mxu1 %v1592_v54  ;;  %v276_v54 = vld [vmem:[%s2745_s1 + $0x790] sm:$0xff]  ;;  %v1646_v59 = vpack.c.bf16 %v259_v51, %v258_v49  ;;  %v282_v30 = vld [vmem:[%s2745_s1 + $0x7c0] sm:$0xff]  ;;  %v235_v36 = vld [vmem:[%s2745_s1 + $0x648] sm:$0xff] }
  0x51   :  { %1563 = vmatpush3.bf16.msra.mxu0 %v1562_v60  ;;  %v1616_v60 = vpack.c.bf16 %v245_v53, %v244_v52  ;;  %v1648_v0 = vpack.c.bf16 %v277_v55, %v276_v54  ;;  %v234_v35 = vld [vmem:[%s2745_s1 + $0x640] sm:$0xff]  ;;  %v267_v39 = vld [vmem:[%s2745_s1 + $0x748] sm:$0xff]  ;;  %v253_v41 = vld [vmem:[%s2745_s1 + $0x6d8] sm:$0xff] }
  0x52   :  { %1565 = vmatprep.subr.bf16.mxu0 %v1564_v62  ;;  %v229_v62 = vld [vmem:[%s2745_s1 + $0x618] sm:$0xff]  ;;  %v266_v37 = vld [vmem:[%s2745_s1 + $0x740] sm:$0xff]  ;;  %v284_v42 = vld [vmem:[%s2745_s1 + $0x7d0] sm:$0xff] }
  0x53   :  { %1595 = vmatpush3.bf16.msra.mxu1 %v1594_v61  ;;  %v228_v61 = vld [vmem:[%s2745_s1 + $0x610] sm:$0xff]  ;;  %v285_v43 = vld [vmem:[%s2745_s1 + $0x7d8] sm:$0xff]  ;;  %v254_v52 = vld [vmem:[%s2745_s1 + $0x6e0] sm:$0xff] }
  0x54   :  { %1597 = vmatprep.subr.bf16.mxu1 %v1596_v2  ;;  %v246_v2 = vld [vmem:[%s2745_s1 + $0x6a0] sm:$0xff]  ;;  %v1618_v7 = vpack.c.bf16 %v229_v62, %v228_v61  ;;  %v236_v47 = vld [vmem:[%s2745_s1 + $0x650] sm:$0xff]  ;;  %v237_v48 = vld [vmem:[%s2745_s1 + $0x658] sm:$0xff] }
  0x55   :  { %1567 = vmatpush3.bf16.msra.mxu0 %v1566_v8  ;;  %v30_v8 = vld [vmem:[%s2746_s0 + $0x78] sm:$0xff]  ;;  %v268_v49 = vld [vmem:[%s2745_s1 + $0x750] sm:$0xff]  ;;  %v255_v53 = vld [vmem:[%s2745_s1 + $0x6e8] sm:$0xff] }
  0x56   :  { %1569 = vmatprep.subr.bf16.mxu0 %v1568_v10  ;;  %v1620_v10 = vpack.c.bf16 %v247_v3, %v246_v2  ;;  %v269_v51 = vld [vmem:[%s2745_s1 + $0x758] sm:$0xff]  ;;  %v286_v54 = vld [vmem:[%s2745_s1 + $0x7e0] sm:$0xff]  ;;  %v287_v55 = vld [vmem:[%s2745_s1 + $0x7e8] sm:$0xff] }
  0x57   :  { %1599 = vmatpush3.bf16.msra.mxu1 %v1598_v9  ;;  %v1650_v9 = vpack.c.bf16 %v261_v1, %v260_v63  ;;  %v270_v61 = vld [vmem:[%s2745_s1 + $0x760] sm:$0xff]  ;;  %v1668_v62 = vpack.c.bf16 %v287_v55, %v286_v54  ;;  %v271_v63 = vld [vmem:[%s2745_s1 + $0x768] sm:$0xff]  ;;  %v257_v1 = vld [vmem:[%s2745_s1 + $0x6f8] sm:$0xff] }
  0x58   :  { %1601 = vmatprep.subr.bf16.mxu1 %v1600_v14  ;;  %v1652_v14 = vpack.c.bf16 %v279_v5, %v278_v4  ;;  %v288_v2 = vld [vmem:[%s2745_s1 + $0x7f0] sm:$0xff]  ;;  %v289_v3 = vld [vmem:[%s2745_s1 + $0x7f8] sm:$0xff]  ;;  %v1670_v5 = vpack.c.bf16 %v271_v63, %v270_v61  ;;  %v331_v63 = vld [vmem:[%s2745_s1 + $0x948] sm:$0xff] }
  0x59   :  { %1571 = vmatpush3.bf16.msra.mxu0 %v1570_v20  ;;  %v1622_v20 = vpack.c.bf16 %v231_v12, %v230_v11  ;;  %v273_v11 = vld [vmem:[%s2745_s1 + $0x778] sm:$0xff]  ;;  %v306_v12 = vld [vmem:[%s2745_s1 + $0x880] sm:$0xff] }
  0x5a   :  { %1573 = vmatprep.subr.bf16.mxu0 %v1572_v22  ;;  %v1624_v22 = vpack.c.bf16 %v249_v17, %v248_v16  ;;  %v290_v17 = vld [vmem:[%s2745_s1 + $0x800] sm:$0xff]  ;;  %v329_v54 = vld [vmem:[%s2745_s1 + $0x938] sm:$0xff] }
  0x5b   :  { %1603 = vmatpush3.bf16.msra.mxu1 %v1602_v21  ;;  %v1654_v21 = vpack.c.bf16 %v263_v15, %v262_v13  ;;  %v307_v13 = vld [vmem:[%s2745_s1 + $0x888] sm:$0xff]  ;;  %v317_v61 = vld [vmem:[%s2745_s1 + $0x8d8] sm:$0xff] }
  0x5c   :  { %1605 = vmatprep.subr.bf16.mxu1 %v1604_v26  ;;  %v1656_v26 = vpack.c.bf16 %v281_v19, %v280_v18  ;;  %v1676_v16 = vpack.c.bf16 %v307_v13, %v306_v12  ;;  %v291_v18 = vld [vmem:[%s2745_s1 + $0x808] sm:$0xff]  ;;  %v308_v19 = vld [vmem:[%s2745_s1 + $0x890] sm:$0xff] }
  0x5d   :  { %1575 = vmatpush3.bf16.msra.mxu0 %v1574_v32  ;;  %v1626_v32 = vpack.c.bf16 %v233_v24, %v232_v23  ;;  %v27_v23 = vld [vmem:[%s2746_s0 + $0x60] sm:$0xff]  ;;  %v1678_v24 = vpack.c.bf16 %v291_v18, %v290_v17  ;;  %v303_v12 = vld [vmem:[%s2745_s1 + $0x868] sm:$0xff] }
  0x5e   :  { %1577 = vmatprep.subr.bf16.mxu0 %v1576_v34  ;;  %v1628_v34 = vpack.c.bf16 %v251_v29, %v250_v28  ;;  %v293_v28 = vld [vmem:[%s2745_s1 + $0x818] sm:$0xff]  ;;  %v335_v17 = vld [vmem:[%s2745_s1 + $0x968] sm:$0xff] }
  0x5f   :  { %1607 = vmatpush3.bf16.msra.mxu1 %v1606_v33  ;;  %v1658_v33 = vpack.c.bf16 %v265_v27, %v264_v25  ;;  %v29_v25 = vld [vmem:[%s2746_s0 + $0x70] sm:$0xff] }
  0x60   :  { %1609 = vmatprep.subr.bf16.mxu1 %v1608_v38  ;;  %v1660_v38 = vpack.c.bf16 %v283_v31, %v282_v30  ;;  %v292_v27 = vld [vmem:[%s2745_s1 + $0x810] sm:$0xff]  ;;  %v310_v30 = vld [vmem:[%s2745_s1 + $0x8a0] sm:$0xff]  ;;  %v1739_v31 = vmov 0.0|0.0  }
  0x61   :  { %1579 = vmatpush3.bf16.msra.mxu0 %v1578_v44  ;;  %v1630_v44 = vpack.c.bf16 %v235_v36, %v234_v35  ;;  %v32_v35 = vld [vmem:[%s2746_s0 + $0x88] sm:$0xff]  ;;  %v1682_v36 = vpack.c.bf16 %v293_v28, %v292_v27  ;;  %v31_v27 = vld [vmem:[%s2746_s0 + $0x80] sm:$0xff]  ;;  %v33_v28 = vld [vmem:[%s2746_s0 + $0x90] sm:$0xff] }
  0x62   :  { %1613 = vmatprep.subr.bf16.mxu0 %v1612_v46  ;;  %v1632_v46 = vpack.c.bf16 %v253_v41, %v252_v40  ;;  %v312_v41 = vld [vmem:[%s2745_s1 + $0x8b0] sm:$0xff] }
  0x63   :  { %1611 = vmatpush3.bf16.msra.mxu1 %v1610_v45  ;;  %v1662_v45 = vpack.c.bf16 %v267_v39, %v266_v37  ;;  %v295_v39 = vld [vmem:[%s2745_s1 + $0x828] sm:$0xff] }
  0x64   :  { %1645 = vmatprep.subr.bf16.mxu1 %v1644_v50  ;;  %685 = vmatmul.mubr.f32.vlgmr.msra.gmra.mrb[4].mxu0 %v23_v56  ;;  %v1664_v50 = vpack.c.bf16 %v285_v43, %v284_v42  ;;  %v1634_v56 = vpack.c.bf16 %v237_v48, %v236_v47  ;;  %v313_v42 = vld [vmem:[%s2745_s1 + $0x8b8] sm:$0xff]  ;;  %v326_v43 = vld [vmem:[%s2745_s1 + $0x920] sm:$0xff]  ;;  %v296_v48 = vld [vmem:[%s2745_s1 + $0x830] sm:$0xff] }
  0x65   :  { %1615 = vmatpush3.bf16.msra.mxu0 %v1614_v57  ;;  %824 = vmatprep.mubr.f32.mxu0 %v28_v6  ;;  %v1666_v57 = vpack.c.bf16 %v269_v51, %v268_v49  ;;  %v1688_v47 = vpack.c.bf16 %v313_v42, %v312_v41  ;;  %v297_v49 = vld [vmem:[%s2745_s1 + $0x838] sm:$0xff]  ;;  %v314_v51 = vld [vmem:[%s2745_s1 + $0x8c0] sm:$0xff] }
  0x66   :  { %755 = vmatmul.mubr.f32.vlgmr.msra.gmra.mrb[4].mxu1 %v25_v58  ;;  %1617 = vmatprep.subr.bf16.mxu0 %v1616_v60  ;;  %v1636_v58 = vpack.c.bf16 %v255_v53, %v254_v52  ;;  %v239_v60 = vld [vmem:[%s2745_s1 + $0x668] sm:$0xff]  ;;  %v328_v53 = vld [vmem:[%s2745_s1 + $0x930] sm:$0xff]  ;;  %v1690_v55 = vpack.c.bf16 %v297_v49, %v296_v48 }
  0x67   :  { %1647 = vmatpush3.bf16.msra.mxu1 %v1646_v59  ;;  %894 = vmatprep.mubr.f32.mxu1 %v30_v8  ;;  %v238_v59 = vld [vmem:[%s2745_s1 + $0x660] sm:$0xff]  ;;  %v241_v8 = vld [vmem:[%s2745_s1 + $0x678] sm:$0xff]  ;;  %v315_v52 = vld [vmem:[%s2745_s1 + $0x8c8] sm:$0xff] }
  0x68   :  { %1649 = vmatprep.subr.bf16.mxu1 %v1648_v0  ;;  %v256_v0 = vld [vmem:[%s2745_s1 + $0x6f0] sm:$0xff]  ;;  %v1638_v4 = vpack.c.bf16 %v239_v60, %v238_v59  ;;  %v1718_v59 = vpack.c.bf16 %v329_v54, %v328_v53 }
  0x69   :  { %1619 = vmatpush3.bf16.msra.mxu0 %v1618_v7  ;;  %v1640_v6 = vpack.c.bf16 %v257_v1, %v256_v0  ;;  %v240_v7 = vld [vmem:[%s2745_s1 + $0x670] sm:$0xff] }
  0x6a   :  { %1621 = vmatprep.subr.bf16.mxu0 %v1620_v10  ;;  %v1672_v10 = vpack.c.bf16 %v289_v3, %v288_v2  ;;  %v316_v60 = vld [vmem:[%s2745_s1 + $0x8d0] sm:$0xff]  ;;  %v301_v3 = vld [vmem:[%s2745_s1 + $0x858] sm:$0xff] }
  0x6b   :  { %1651 = vmatpush3.bf16.msra.mxu1 %v1650_v9  ;;  %v272_v9 = vld [vmem:[%s2745_s1 + $0x770] sm:$0xff]  ;;  %v1696_v1 = vpack.c.bf16 %v317_v61, %v316_v60 }
  0x6c   :  { %1653 = vmatprep.subr.bf16.mxu1 %v1652_v14  ;;  %v1642_v14 = vpack.c.bf16 %v241_v8, %v240_v7  ;;  %v1674_v15 = vpack.c.bf16 %v273_v11, %v272_v9  ;;  %v300_v2 = vld [vmem:[%s2745_s1 + $0x850] sm:$0xff]  ;;  %v333_v8 = vld [vmem:[%s2745_s1 + $0x958] sm:$0xff]  ;;  %v302_v11 = vld [vmem:[%s2745_s1 + $0x860] sm:$0xff] }
  0x6d   :  { %1623 = vmatpush3.bf16.msra.mxu0 %v1622_v20  ;;  %v309_v20 = vld [vmem:[%s2745_s1 + $0x898] sm:$0xff]  ;;  %v332_v7 = vld [vmem:[%s2745_s1 + $0x950] sm:$0xff]  ;;  %v1698_v9 = vpack.c.bf16 %v301_v3, %v300_v2  ;;  %v1702_v18 = vpack.c.bf16 %v303_v12, %v302_v11 }
  0x6e   :  { %1625 = vmatprep.subr.bf16.mxu0 %v1624_v22  ;;  %v323_v22 = vld [vmem:[%s2745_s1 + $0x908] sm:$0xff]  ;;  %v1724_v13 = vpack.c.bf16 %v333_v8, %v332_v7 }
  0x6f   :  { %1655 = vmatpush3.bf16.msra.mxu1 %v1654_v21  ;;  %v322_v21 = vld [vmem:[%s2745_s1 + $0x900] sm:$0xff] }
  0x70   :  { %1657 = vmatprep.subr.bf16.mxu1 %v1656_v26  ;;  %v1680_v26 = vpack.c.bf16 %v309_v20, %v308_v19  ;;  %v1709_v29 = vpack.c.bf16 %v323_v22, %v322_v21  ;;  %v304_v20 = vld [vmem:[%s2745_s1 + $0x870] sm:$0xff]  ;;  %v305_v21 = vld [vmem:[%s2745_s1 + $0x878] sm:$0xff] }
  0x71   :  { %1627 = vmatpush3.bf16.msra.mxu0 %v1626_v32  ;;  %v311_v32 = vld [vmem:[%s2745_s1 + $0x8a8] sm:$0xff] }
  0x72   :  { %1629 = vmatprep.subr.bf16.mxu0 %v1628_v34  ;;  %v325_v34 = vld [vmem:[%s2745_s1 + $0x918] sm:$0xff]  ;;  %v1684_v37 = vpack.c.bf16 %v311_v32, %v310_v30  ;;  %v339_v30 = vstv %s2747_s2 }
  0x73   :  { %1659 = vmatpush3.bf16.msra.mxu1 %v1658_v33  ;;  %v324_v33 = vld [vmem:[%s2745_s1 + $0x910] sm:$0xff] }
  0x74   :  { %1661 = vmatprep.subr.bf16.mxu1 %v1660_v38  ;;  %v294_v38 = vld [vmem:[%s2745_s1 + $0x820] sm:$0xff]  ;;  %v1712_v40 = vpack.c.bf16 %v325_v34, %v324_v33 }
  0x75   :  { %1631 = vmatpush3.bf16.msra.mxu0 %v1630_v44  ;;  %v327_v44 = vld [vmem:[%s2745_s1 + $0x928] sm:$0xff] }
  0x76   :  { %1633 = vmatprep.subr.bf16.mxu0 %v1632_v46  ;;  %v1686_v46 = vpack.c.bf16 %v295_v39, %v294_v38 }
  0x77   :  { %1663 = vmatpush3.bf16.msra.mxu1 %v1662_v45  ;;  %v1741_v45 = vmov 0.0  }
  0x78   :  { %1665 = vmatprep.subr.bf16.mxu1 %v1664_v50  ;;  %v1715_v50 = vpack.c.bf16 %v327_v44, %v326_v43 }
  0x79   :  { %1635 = vmatpush3.bf16.msra.mxu0 %v1634_v56  ;;  %v1692_v56 = vpack.c.bf16 %v315_v52, %v314_v51 }
  0x7a   :  { %1637 = vmatprep.subr.bf16.mxu0 %v1636_v58  ;;  %v299_v58 = vld [vmem:[%s2745_s1 + $0x848] sm:$0xff] }
  0x7b   :  { %1667 = vmatpush3.bf16.msra.mxu1 %v1666_v57  ;;  %v298_v57 = vld [vmem:[%s2745_s1 + $0x840] sm:$0xff] }
  0x7c   :  { %1669 = vmatprep.subr.bf16.mxu1 %v1668_v62  ;;  %v330_v62 = vld [vmem:[%s2745_s1 + $0x940] sm:$0xff]  ;;  %v1694_v0 = vpack.c.bf16 %v299_v58, %v298_v57 }
  0x7d   :  { %1639 = vmatpush3.bf16.msra.mxu0 %v1638_v4  ;;  %v1721_v4 = vpack.c.bf16 %v331_v63, %v330_v62 }
  0x7e   :  { %1641 = vmatprep.subr.bf16.mxu0 %v1640_v6  ;;  %v319_v6 = vld [vmem:[%s2745_s1 + $0x8e8] sm:$0xff] }
  0x7f   :  { %1671 = vmatpush3.bf16.msra.mxu1 %v1670_v5  ;;  %v318_v5 = vld [vmem:[%s2745_s1 + $0x8e0] sm:$0xff] }
  0x80   :  { %1673 = vmatprep.subr.bf16.mxu1 %v1672_v10  ;;  %v1700_v10 = vpack.c.bf16 %v319_v6, %v318_v5 }
  0x81   :  { %1643 = vmatpush3.bf16.msra.mxu0 %v1642_v14  ;;  %v320_v14 = vld [vmem:[%s2745_s1 + $0x8f0] sm:$0xff] }
  0x82   :  { %1677 = vmatprep.subr.bf16.mxu0 %v1676_v16  ;;  %v334_v16 = vld [vmem:[%s2745_s1 + $0x960] sm:$0xff] }
  0x83   :  { %1675 = vmatpush3.bf16.msra.mxu1 %v1674_v15  ;;  %v321_v15 = vld [vmem:[%s2745_s1 + $0x8f8] sm:$0xff]  ;;  %v1727_v22 = vpack.c.bf16 %v335_v17, %v334_v16 }
  0x84   :  { %1708 = vmatprep.subr.bf16.mxu1 %v1739_v31  ;;  %825 = vmatmul.mubr.f32.vlgmr.msra.gmra.mrb[6].mxu0 %v27_v23  ;;  %v1704_v19 = vpack.c.bf16 %v321_v15, %v320_v14  ;;  %v336_v23 = vld [vmem:[%s2745_s1 + $0x970] sm:$0xff] }
  0x85   :  { %1679 = vmatpush3.bf16.msra.mxu0 %v1678_v24  ;;  %964 = vmatprep.mubr.f32.mxu0 %v32_v35  ;;  %v337_v24 = vld [vmem:[%s2745_s1 + $0x978] sm:$0xff] }
  0x86   :  { %895 = vmatmul.mubr.f32.vlgmr.msra.gmra.mrb[6].mxu1 %v29_v25  ;;  %1681 = vmatprep.subr.bf16.mxu0 %v1680_v26  ;;  %v1706_v25 = vpack.c.bf16 %v305_v21, %v304_v20  ;;  %v1730_v26 = vpack.c.bf16 %v337_v24, %v336_v23 }
  0x87   :  { %1710 = vmatpush3.bf16.msra.mxu1 %v1709_v29  ;;  %1417 = vmatprep.mubr.msk.f32.mxu1 %vm1740_vm0, %v1741_v45 }
  0x88   :  { %1711 = vmatprep.subr.bf16.mxu1 %v1739_v31 }
  0x89   :  { %1683 = vmatpush3.bf16.msra.mxu0 %v1682_v36 }
  0x8a   :  { %1685 = vmatprep.subr.bf16.mxu0 %v1684_v37 }
  0x8b   :  { %1713 = vmatpush3.bf16.msra.mxu1 %v1712_v40 }
  0x8c   :  { %1714 = vmatprep.subr.bf16.mxu1 %v1739_v31 }
  0x8d   :  { %1687 = vmatpush3.bf16.msra.mxu0 %v1686_v46 }
  0x8e   :  { %1689 = vmatprep.subr.bf16.mxu0 %v1688_v47 }
  0x8f   :  { %1716 = vmatpush3.bf16.msra.mxu1 %v1715_v50 }
  0x90   :  { %1717 = vmatprep.subr.bf16.mxu1 %v1739_v31 }
  0x91   :  { %1691 = vmatpush3.bf16.msra.mxu0 %v1690_v55 }
  0x92   :  { %1693 = vmatprep.subr.bf16.mxu0 %v1692_v56 }
  0x93   :  { %1719 = vmatpush3.bf16.msra.mxu1 %v1718_v59 }
  0x94   :  { %1720 = vmatprep.subr.bf16.mxu1 %v1739_v31 }
  0x95   :  { %1695 = vmatpush3.bf16.msra.mxu0 %v1694_v0 }
  0x96   :  { %1697 = vmatprep.subr.bf16.mxu0 %v1696_v1 }
  0x97   :  { %1722 = vmatpush3.bf16.msra.mxu1 %v1721_v4 }
  0x98   :  { %1723 = vmatprep.subr.bf16.mxu1 %v1739_v31 }
  0x99   :  { %1699 = vmatpush3.bf16.msra.mxu0 %v1698_v9 }
  0x9a   :  { %1701 = vmatprep.subr.bf16.mxu0 %v1700_v10 }
  0x9b   :  { %1725 = vmatpush3.bf16.msra.mxu1 %v1724_v13 }
  0x9c   :  { %1726 = vmatprep.subr.bf16.mxu1 %v1739_v31 }
  0x9d   :  { %1703 = vmatpush3.bf16.msra.mxu0 %v1702_v18 }
  0x9e   :  { %1705 = vmatprep.subr.bf16.mxu0 %v1704_v19 }
  0x9f   :  { %1728 = vmatpush3.bf16.msra.mxu1 %v1727_v22 }
  0xa0   :  { %1729 = vmatprep.subr.bf16.mxu1 %v1739_v31 }
  0xa1   :  { %1707 = vmatpush3.bf16.msra.mxu0 %v1706_v25 }
  0xa3   :  { %1731 = vmatpush3.bf16.msra.mxu1 %v1730_v26 }
  0xa4   :  { %965 = vmatmul.mubr.f32.vlgmr.msra.gmra.mrb[8].mxu0 %v31_v27 }
  0xa6   :  { %1418 = vmatmul.mubr.f32.vlgmr.msra.gmra.mrb[8].mxu1 %v33_v28 }
  0xf7   :  { %v1085_v29 = vpop.f32.mrb[0].mxu0 }
  0xf8   :  { %v1086_v32 = vpop.f32.mrb[1].mxu0 }
  0xf9   :  { %v1120_v33 = vpop.f32.mrb[0].mxu1  ;;  %v1087_v31 = vadd.f32 %v1086_v32, %v1085_v29 }
  0xfa   :  { %v1121_v34 = vpop.f32.mrb[1].mxu1 }
  0xfb   :  { %v1122_v35 = vadd.f32 %v1121_v34, %v1120_v33  ;;  %v407_v36 = vadd.f32 %v1087_v31, %v339_v30 }
  0xfd   :  { %v477_v37 = vadd.f32 %v1122_v35, %v407_v36 }
 0x117   :  { %v1155_v38 = vpop.f32.mrb[2].mxu0 }
 0x118   :  { %v1156_v39 = vpop.f32.mrb[3].mxu0 }
 0x119   :  { %v1190_v40 = vpop.f32.mrb[2].mxu1  ;;  %v1157_v41 = vadd.f32 %v1156_v39, %v1155_v38 }
 0x11a   :  { %v1191_v42 = vpop.f32.mrb[3].mxu1 }
 0x11b   :  { %v1192_v43 = vadd.f32 %v1191_v42, %v1190_v40  ;;  %v547_v44 = vadd.f32 %v1157_v41, %v477_v37 }
 0x11d   :  { %v617_v45 = vadd.f32 %v1192_v43, %v547_v44 }
 0x137   :  { %v1225_v46 = vpop.f32.mrb[4].mxu0 }
 0x138   :  { %v1226_v47 = vpop.f32.mrb[5].mxu0 }
 0x139   :  { %v1260_v48 = vpop.f32.mrb[4].mxu1  ;;  %v1227_v49 = vadd.f32 %v1226_v47, %v1225_v46 }
 0x13a   :  { %v1261_v50 = vpop.f32.mrb[5].mxu1 }
 0x13b   :  { %v1262_v51 = vadd.f32 %v1261_v50, %v1260_v48  ;;  %v687_v52 = vadd.f32 %v1227_v49, %v617_v45 }
 0x13d   :  { %v757_v53 = vadd.f32 %v1262_v51, %v687_v52 }
 0x157   :  { %v1295_v54 = vpop.f32.mrb[6].mxu0 }
 0x158   :  { %v1296_v55 = vpop.f32.mrb[7].mxu0 }
 0x159   :  { %v1330_v56 = vpop.f32.mrb[6].mxu1  ;;  %v1297_v57 = vadd.f32 %v1296_v55, %v1295_v54 }
 0x15a   :  { %v1331_v58 = vpop.f32.mrb[7].mxu1 }
 0x15b   :  { %v1332_v59 = vadd.f32 %v1331_v58, %v1330_v56  ;;  %v827_v60 = vadd.f32 %v1297_v57, %v757_v53 }
 0x15d   :  { %v897_v61 = vadd.f32 %v1332_v59, %v827_v60 }
 0x177   :  { %v1365_v62 = vpop.f32.mrb[8].mxu0 }
 0x178   :  { %v1366_v63 = vpop.f32.mrb[9].mxu0 }
 0x179   :  { %v1036_v0 = vpop.f32.mrb[8].mxu1  ;;  %v1367_v1 = vadd.f32 %v1366_v63, %v1365_v62 }
 0x17a   :  { %v1419_v2 = vpop.f32.mrb[9].mxu1 }
 0x17b   :  { %v967_v3 = vadd.f32 %v1367_v1, %v897_v61 }
 0x17d   :  { %v1037_v4 = vadd.f32 %v1036_v0, %v967_v3 }
 0x17f   :  { %v1052_v5 = vmul.f32 -1.442695, %v1037_v4 }
 0x181   :  { %1735 = vpow2.f32 %v1052_v5 }
 0x18b   :  { %v1736_v6 = vpop.eup %1735 }
 0x18c   :  { %v1043_v7 = vadd.f32 1.0, %v1736_v6 }
 0x18e   :  { %1737 = vrcp.f32 %v1043_v7 }
 0x198   :  { %v1738_v8 = vpop.eup %1737 }
 0x199   :  { %1047 = vst.msk [vmem:[%s2748_s3] sm:$0xff] %vm1046_vm1, %v1738_v8 }

</bundles_post_ra>
